<compile_context>
chip_gen: v7x
topology: tpu7x:2x2x1
jax: 0.10.0
libtpu: 0.0.40
codegen_flags: <defaults>
</compile_context>

<pallas_src>
import jax
import jax.numpy as jnp
from jax.experimental import pallas as pl
from jax.experimental.pallas import tpu as pltpu


def _patch_proj_kernel(x_ref, w_ref, b_ref, o_ref):
    # x_ref : (TM, K)    tile of flattened patches (voxels on sublane, K on lane)
    # w_ref : (K, TN)    weight tile (lane = embedding dim -> lane-dense output)
    # b_ref : (1, TN)    bias tile
    # o_ref : (TM, TN)   output tile
    acc = jnp.dot(x_ref[...], w_ref[...], preferred_element_type=jnp.float32)
    o_ref[...] = (acc + b_ref[...]).astype(o_ref.dtype)


def _round_up(x, m):
    return (x + m - 1) // m * m


def patch_proj_pallas(patches, weight, bias, *, tile_m=1024, tile_n=256):
    """patches: (M, K), weight: (K, E), bias: (E,) -> (M, E)."""
    assert tile_m % 8 == 0 and tile_n % 128 == 0
    M, K = patches.shape
    E = weight.shape[1]
    out_dtype = patches.dtype
    itemsize = jnp.dtype(out_dtype).itemsize

    # Clamp tiles to the (padded) problem, keep (8,128) alignment.
    tile_n = min(tile_n, _round_up(E, 128))
    tile_m = min(tile_m, _round_up(M, 8))

    # Ragged M / E: pad up to the tile instead of shrinking the tile.
    Mp = _round_up(M, tile_m)
    Ep = _round_up(E, tile_n)
    if Mp != M:
        patches = jnp.pad(patches, ((0, Mp - M), (0, 0)))
    if Ep != E:
        weight = jnp.pad(weight, ((0, 0), (0, Ep - E)))
        bias = jnp.pad(bias, (0, Ep - E))
    bias2d = bias.reshape(1, Ep).astype(jnp.float32)

    grid = (Mp // tile_m, Ep // tile_n)

    # VMEM budget: double-buffered x / w / bias / out tiles + headroom.
    tile_bytes = 2 * (tile_m * K + K * tile_n + tile_n + tile_m * tile_n) * itemsize
    vmem_limit = int(min(max(4 * tile_bytes, 8 << 20), 64 << 20))

    cost = pl.CostEstimate(
        flops=2 * Mp * K * Ep,
        transcendentals=0,
        bytes_accessed=(Mp * K + K * Ep + Ep + Mp * Ep) * itemsize,
    )

    out = pl.pallas_call(
        _patch_proj_kernel,
        out_shape=jax.ShapeDtypeStruct((Mp, Ep), out_dtype),
        grid_spec=pltpu.PrefetchScalarGridSpec(
            num_scalar_prefetch=0,
            grid=grid,
            in_specs=[
                pl.BlockSpec((tile_m, K), lambda i, j: (i, 0)),
                pl.BlockSpec((K, tile_n), lambda i, j: (0, j)),
                pl.BlockSpec((1, tile_n), lambda i, j: (0, j)),
            ],
            out_specs=pl.BlockSpec((tile_m, tile_n), lambda i, j: (i, j)),
        ),
        compiler_params=pltpu.CompilerParams(
            dimension_semantics=("parallel", "parallel"),
            vmem_limit_bytes=vmem_limit,
        ),
        cost_estimate=cost,
    )(patches, weight, bias2d)

    return out[:M, :E]


def patch_embed_forward(x, weight, bias, *, patch_size=(4, 4), kernel_size=1,
                        tile_m=1024, tile_n=256):
    """Pallas-backed PatchEmbed forward.

    x      : (B, C_in, T, H, W)                         -- NCDHW, as in PyTorch
    weight : (E, C_in, kT, pH, pW)                       -- Conv3d weight
    bias   : (E,)
    returns: (B, E, T // kT, H // pH, W // pW)
    """
    pH, pW = patch_size
    kT = kernel_size
    B, C, T, H, W = x.shape
    E = weight.shape[0]
    Tp, Hp, Wp = T // kT, H // pH, W // pW

    # ---- glue: im2col (one XLA pass over x in HBM) --------------------------
    xp = x.reshape(B, C, Tp, kT, Hp, pH, Wp, pW)
    xp = jnp.transpose(xp, (0, 2, 4, 6, 1, 3, 5, 7))        # (B,Tp,Hp,Wp,C,kT,pH,pW)
    patches = xp.reshape(B * Tp * Hp * Wp, C * kT * pH * pW)

    w2d = weight.reshape(E, C * kT * pH * pW).T              # (K, E)

    # ---- hot path: lane-dense patch projection (Pallas / MXU) ---------------
    y = patch_proj_pallas(patches, w2d, bias, tile_m=tile_m, tile_n=tile_n)

    # ---- glue: back to NCDHW -------------------------------------------------
    y = y.reshape(B, Tp, Hp, Wp, E)
    return jnp.transpose(y, (0, 4, 1, 2, 3))                 # (B, E, Tp, Hp, Wp)


def patch_embed_reference(x, weight, bias, *, patch_size=(4, 4), kernel_size=1):
    """Pure-JAX reference mirroring nn.Conv3d(kernel=stride=(kT,pH,pW))."""
    pH, pW = patch_size
    kT = kernel_size
    y = jax.lax.conv_general_dilated(
        x, weight,
        window_strides=(kT, pH, pW),
        padding="VALID",
        dimension_numbers=("NCDHW", "OIDHW", "NCDHW"),
        precision=jax.lax.Precision.HIGHEST,
    )
    return y + bias[None, :, None, None, None]


if __name__ == "__main__":
    # Small shapes consistent with the module (PatchEmbed defaults scaled down).
    B, C_in, T, H, W = 2, 3, 6, 32, 32
    patch_size = (4, 4)
    kernel_size = 2
    embed_dim = 192          # deliberately not a multiple of 128 -> exercises E padding

    key = jax.random.PRNGKey(0)
    kx, kw, kb = jax.random.split(key, 3)
    x = jax.random.normal(kx, (B, C_in, T, H, W), dtype=jnp.float32)
    weight = jax.random.normal(
        kw, (embed_dim, C_in, kernel_size, patch_size[0], patch_size[1]),
        dtype=jnp.float32) * 0.05
    bias = jax.random.normal(kb, (embed_dim,), dtype=jnp.float32) * 0.1

    # Small tiles here just to exercise a multi-step (M, E) grid + padded tails
    # at toy sizes; production shapes should use the (1024, 256) defaults.
    out = patch_embed_forward(x, weight, bias,
                              patch_size=patch_size, kernel_size=kernel_size,
                              tile_m=256, tile_n=128)
    out = jax.block_until_ready(out)

    ref = patch_embed_reference(x, weight, bias,
                                patch_size=patch_size, kernel_size=kernel_size)

    expected_shape = (B, embed_dim, T // kernel_size,
                      H // patch_size[0], W // patch_size[1])
    assert out.shape == expected_shape, out.shape
    assert jnp.allclose(out, ref, atol=2e-4, rtol=2e-4), "mismatch vs reference"

    print("KERNEL_OK")
</pallas_src>

<mosaic_0001>
module attributes {stable_mosaic.version = 11 : i64} {
  func.func @_patch_proj_kernel(%arg0: i32, %arg1: i32, %arg2: memref<256x96xf32, #tpu.memory_space<vmem>>, %arg3: memref<96x128xf32, #tpu.memory_space<vmem>>, %arg4: memref<1x128xf32, #tpu.memory_space<vmem>>, %arg5: memref<256x128xf32, #tpu.memory_space<vmem>>) attributes {dimension_semantics = [#tpu.dimension_semantics<parallel>, #tpu.dimension_semantics<parallel>], iteration_bounds = array<i64: 2, 2>, scalar_prefetch = 0 : i64, scratch_operands = 0 : i64, tpu.core_type = #tpu.core_type<tc>, window_params = [{transform_indices = @transform_0, window_bounds = array<i64: 256, 96>}, {transform_indices = @transform_1, window_bounds = array<i64: 96, 128>}, {transform_indices = @transform_2, window_bounds = array<i64: 1, 128>}, {transform_indices = @transform_3, window_bounds = array<i64: 256, 128>}]} {
    %c0 = arith.constant 0 : index
    %c0_0 = arith.constant 0 : index
    %0 = vector.load %arg2[%c0, %c0_0] : memref<256x96xf32, #tpu.memory_space<vmem>>, vector<256x96xf32>
    %c0_1 = arith.constant 0 : index
    %c0_2 = arith.constant 0 : index
    %1 = vector.load %arg3[%c0_1, %c0_2] : memref<96x128xf32, #tpu.memory_space<vmem>>, vector<96x128xf32>
    %cst = arith.constant dense<0.000000e+00> : vector<256x128xf32>
    %2 = tpu.matmul %0, %1, %cst {dimension_numbers = #tpu.dot_dimension_numbers<[1], [0], [0], [1], [0, 0, 1, 1], [], []>} : vector<256x96xf32>, vector<96x128xf32>, vector<256x128xf32> -> vector<256x128xf32>
    %c0_3 = arith.constant 0 : index
    %c0_4 = arith.constant 0 : index
    %3 = vector.load %arg4[%c0_3, %c0_4] : memref<1x128xf32, #tpu.memory_space<vmem>>, vector<1x128xf32>
    %4 = vector.broadcast %3 : vector<1x128xf32> to vector<256x128xf32>
    %5 = arith.addf %2, %4 : vector<256x128xf32>
    %c0_5 = arith.constant 0 : index
    %c0_6 = arith.constant 0 : index
    %6 = vector.load %arg5[%c0_5, %c0_6] : memref<256x128xf32, #tpu.memory_space<vmem>>, vector<256x128xf32>
    tpu.vector_store %arg5[%c0_5, %c0_6], %5 {strides = array<i32>} : memref<256x128xf32, #tpu.memory_space<vmem>>, vector<256x128xf32>,
    return
  }
  func.func @transform_0(%arg0: i32, %arg1: i32) -> (i32, i32) {
    %c0_i32 = arith.constant 0 : i32
    %c0_i32_0 = arith.constant 0 : i32
    return %arg0, %c0_i32 : i32, i32
  }
  func.func @transform_1(%arg0: i32, %arg1: i32) -> (i32, i32) {
    %c0_i32 = arith.constant 0 : i32
    %c0_i32_0 = arith.constant 0 : i32
    return %c0_i32, %arg1 : i32, i32
  }
  func.func @transform_2(%arg0: i32, %arg1: i32) -> (i32, i32) {
    %c0_i32 = arith.constant 0 : i32
    %c0_i32_0 = arith.constant 0 : i32
    return %c0_i32, %arg1 : i32, i32
  }
  func.func @transform_3(%arg0: i32, %arg1: i32) -> (i32, i32) {
    %c0_i32 = arith.constant 0 : i32
    return %arg0, %arg1 : i32, i32
  }
}

</mosaic_0001>

<bundles_post_ra>
// kernel: tpu_custom_call.1
= control target key start
LH: loop header
LB: loop body
LE: loop exit
PB: predicated region body
PF: predicated region fallthrough
CT: control target
= control target key end

     0   :  { %8 = vsyncpa [#allocation4], 0  ;;  %s1581_s0 = inlined_call_operand.vmem [shape: f32[512,96], index: 0, kind: input, shape index: {}]   ;;  %s1582_s1 = inlined_call_operand.vmem [shape: f32[96,256], index: 1, kind: input, shape index: {}]   ;;  %s1583_s2 = inlined_call_operand.vmem [shape: f32[1,256], index: 2, kind: input, shape index: {}]   ;;  %s1584_s3 = inlined_call_operand.hbm [shape: f32[512,256], index: 3, kind: output, shape index: {}]  }
   0x1   :  { %10 = vsyncpa [#allocation4 + $0x1], 0  ;;  %s1250_s12 = smov 0   ;;  %s1252_s13 = smov 0  }
   0x2   :  { %s1254_s14 = smov 0   ;;  %s1256_s15 = smov 0  }
   0x3   :  { %s1258_s16 = smov 0   ;;  %s1260_s17 = smov 0  }
   0x4   :  { %s1262_s18 = smov 0   ;;  %s1264_s19 = smov 0  }
   0x5   :  { %s1266_s20 = smov 0   ;;  %s1268_s21 = smov 0  }
   0x6 LB: > { %s821_s22 = sadd.s32 4294967295, %s1224_s21   ;;  %s822_s23 = sadd.s32 4294967294, %s1224_s21   ;;  %s1224_s21 = sphi %s1268_s21, %s16_s21   ;;  %s1220_s20 = sphi %s1266_s20, %s1596_s20   ;;  %s1216_s19 = sphi %s1264_s19, %s1595_s19   ;;  %s1212_s18 = sphi %s1262_s18, %s1594_s18   ;;  %s1208_s17 = sphi %s1260_s17, %s1593_s17   ;;  %s1204_s16 = sphi %s1258_s16, %s1592_s16   ;;  %s1200_s15 = sphi %s1256_s15, %s1591_s15   ;;  %s1196_s14 = sphi %s1254_s14, %s1590_s14   ;;  %s1192_s13 = sphi %s1252_s13, %s1589_s13   ;;  %s1188_s12 = sphi %s1250_s12, %s1588_s12  }
   0x7   : > { %s25_s24 = sadd.s32 1, %s1216_s19  ;;  %s28_s25 = sadd.s32 1, %s1220_s20 }
   0x8   : > { %p26_p0 = scmp.ge.s32.totalorder %s25_s24, 2  ;;  %s61_s26 = sadd.s32 1, %s1204_s16 }
   0x9   : > { %p68_p1 = scmp.ne.s32.totalorder %s1204_s16, %s1200_s15  ;;  %p69_p2 = scmp.eq.s32.totalorder %s1224_s21, 0 }
   0xa   : > { %s1598_s24 = smov (%p26_p0, %s25_s24), 0  ;;  %s1600_s25 = smov (!%p26_p0, %s28_s25), %s1220_s20 }
   0xb   : > { %s58_s27 = ssub.s32 %s1216_s19, %s1598_s24  ;;  %p1313_p3 = por %p69_p2, %p68_p1 }
   0xc   : > { %p30_p4 = scmp.ge.s32.totalorder %s1600_s25, 2  ;;  %p59_p5 = scmp.eq.s32.totalorder %s58_s27, 0 }
   0xd   : > { %s115_s29 = sadd.s32 1, %s1196_s14  ;;  %p125_p6 = scmp.ne.s32.totalorder %s1196_s14, %s1192_s13 }
   0xe   : > { %s1602_s25 = smov (%p30_p4, %s1600_s25), 0  ;;  %p126_p7 = scmp.eq.s32.totalorder %s821_s22, 3 }
   0xf   : > { %s1323_s30 = scalar_select %p59_p5, %s1204_s16, %s61_s26  }
  0x10   : > { %s110_s4 = ssub.s32 %s1220_s20, %s1602_s25  ;;  %p131_p8 = scmp.ne.s32.totalorder %s1192_s13, %s1188_s12 }
  0x11   : > { %s112_s5 = sor.u32 %s110_s4, %s58_s27  ;;  %p1329_p10 = por %p126_p7, %p125_p6 }
  0x12   : > { %p113_p9 = scmp.eq.s32.totalorder %s112_s5, 0  ;;  %p132_p11 = scmp.eq.s32.totalorder %s822_s23, 3 }
  0x13   : > { %p824_p13 = scmp.ge.s32.totalorder %s1224_s21, 4 }
  0x14   : > { %s1334_s7 = scalar_select %p113_p9, %s1196_s14, %s115_s29  }
  0x15   : > { %p1336_p12 = por %p132_p11, %p131_p8  ;;  %148 = sbr.rel (%p824_p13) target bundleno = 38 (0x26), region = 16 }
  0x1c   : > { %160 = sbr.rel (!%p1313_p3) target bundleno = 38 (0x26), region = 24  ;;  %s162_s9 = sand.u32 (%p1313_p3), 1, %s1204_s16  }
  0x1d   : > { %s825_s10 = sshll.u32 (%p1313_p3), %s1216_s19, 3  ;;  %s1022_s11 = smul.u32 (%p1313_p3), 96, %s162_s9 }
  0x1e   : > { %s166_s23 = scalar_lea.vmem (%p1313_p3), %s1582_s1, %s825_s10 }
  0x1f   : > { %v216_v0 = vld [vmem:[%s166_s23] sm:$0xff] (%p1313_p3)  ;;  %v218_v1 = vld [vmem:[%s166_s23 + $0x10] sm:$0xff] (%p1313_p3)  ;;  %s164_s27 = scalar_lea.vmem (%p1313_p3), [#allocation2], %s1022_s11 }
  0x20   : > { %v220_v2 = vld [vmem:[%s166_s23 + $0x20] sm:$0xff] (%p1313_p3)  ;;  %v222_v3 = vld [vmem:[%s166_s23 + $0x30] sm:$0xff] (%p1313_p3)  ;;  %217 = vst [vmem:[%s164_s27] sm:$0xff] (%p1313_p3), %v216_v0  ;;  %219 = vst [vmem:[%s164_s27 + $0x8] sm:$0xff] (%p1313_p3), %v218_v1 }
  0x21   : > { %v224_v4 = vld [vmem:[%s166_s23 + $0x40] sm:$0xff] (%p1313_p3)  ;;  %v226_v5 = vld [vmem:[%s166_s23 + $0x50] sm:$0xff] (%p1313_p3)  ;;  %221 = vst [vmem:[%s164_s27 + $0x10] sm:$0xff] (%p1313_p3), %v220_v2  ;;  %223 = vst [vmem:[%s164_s27 + $0x18] sm:$0xff] (%p1313_p3), %v222_v3 }
  0x22   : > { %225 = vst [vmem:[%s164_s27 + $0x20] sm:$0xff] (%p1313_p3), %v224_v4  ;;  %227 = vst [vmem:[%s164_s27 + $0x28] sm:$0xff] (%p1313_p3), %v226_v5  ;;  %v228_v6 = vld [vmem:[%s166_s23 + $0x60] sm:$0xff] (%p1313_p3)  ;;  %v230_v7 = vld [vmem:[%s166_s23 + $0x70] sm:$0xff] (%p1313_p3) }
  0x23   : > { %v232_v8 = vld [vmem:[%s166_s23 + $0x80] sm:$0xff]  ;;  %229 = vst [vmem:[%s164_s27 + $0x30] sm:$0xff] %v228_v6  ;;  %231 = vst [vmem:[%s164_s27 + $0x38] sm:$0xff] %v230_v7  ;;  %v234_v9 = vld [vmem:[%s166_s23 + $0x90] sm:$0xff] }
  0x24   : > { %233 = vst [vmem:[%s164_s27 + $0x40] sm:$0xff] %v232_v8  ;;  %v236_v10 = vld [vmem:[%s166_s23 + $0xa0] sm:$0xff]  ;;  %v238_v11 = vld [vmem:[%s166_s23 + $0xb0] sm:$0xff]  ;;  %235 = vst [vmem:[%s164_s27 + $0x48] sm:$0xff] %v234_v9 }
  0x25   : > { %237 = vst [vmem:[%s164_s27 + $0x50] sm:$0xff] %v236_v10  ;;  %239 = vst [vmem:[%s164_s27 + $0x58] sm:$0xff] %v238_v11 }
  0x26 PF: > { %p826_p0 = scmp.ge.s32.totalorder %s1224_s21, 1  ;;  %p250_p1 = scmp.lt.s32.totalorder %s1224_s21, 5 }
  0x28   : > { %p251_p2 = pnand %p826_p0, %p250_p1 }
  0x29   : > { %s257_s28 = sand.u32 (!%p251_p2), 1, %s1200_s15   ;;  %s828_s29 = sshll.u32 (!%p251_p2), %s1212_s18, 5  ;;  %vm349_vm0 = vcmask (!%p251_p2), 785408  }
  0x2a   : > { %254 = sbr.rel (%p251_p2) target bundleno = 333 (0x14d), region = 66  ;;  %p289_p3 = scmp.lt.s32.totalorder (!%p251_p2), %s828_s29, 63 }
  0x2b   : > { %s1023_s4 = smul.u32 (!%p251_p2), 96, %s257_s28  ;;  %p294_p4 = scmp.lt.s32.totalorder (!%p251_p2), %s1208_s17, 1 }
  0x2c   : > { %s285_s26 = sand.u32 (!%p251_p2), 1, %s1192_s13   ;;  %s1226_s27 = smov (!%p251_p2), [#allocation3]  }
  0x2d   : > { %s1352_s5 = scalar_lea.vmem (!%p251_p2), [#allocation2], %s1023_s4 }
  0x2e   : > { %v330_v12 = vld [vmem:[%s1352_s5] sm:$0xff] (!%p251_p2)  ;;  %v331_v13 = vld [vmem:[%s1352_s5 + $0x8] sm:$0xff] (!%p251_p2)  ;;  %v332_v14 = vld [vmem:[%s1352_s5 + $0x10] sm:$0xff] (!%p251_p2) }
  0x2f   : > { %v986_v15 = vpack.c.bf16 (!%p251_p2), %v331_v13, %v330_v12  ;;  %v333_v16 = vld [vmem:[%s1352_s5 + $0x18] sm:$0xff] (!%p251_p2)  ;;  %v334_v18 = vld [vmem:[%s1352_s5 + $0x20] sm:$0xff] (!%p251_p2)  ;;  %v335_v19 = vld [vmem:[%s1352_s5 + $0x28] sm:$0xff] (!%p251_p2) }
  0x30   : > { %v990_v17 = vpack.c.bf16 (!%p251_p2), %v333_v16, %v332_v14  ;;  %v994_v22 = vpack.c.bf16 (!%p251_p2), %v335_v19, %v334_v18  ;;  %v336_v23 = vld [vmem:[%s1352_s5 + $0x30] sm:$0xff] (!%p251_p2)  ;;  %v337_v24 = vld [vmem:[%s1352_s5 + $0x38] sm:$0xff] (!%p251_p2)  ;;  %v338_v26 = vld [vmem:[%s1352_s5 + $0x40] sm:$0xff] (!%p251_p2) }
  0x31   : > { %s1604_s29 = smov (!%p289_p3, %s828_s29), 63  ;;  %987 = vmatprep.subr.bf16.mxu0 %v986_v15  ;;  %1010 = vmatprep.subr.bf16.mxu1 %v986_v15  ;;  %v998_v25 = vpack.c.bf16 %v337_v24, %v336_v23  ;;  %v339_v27 = vld [vmem:[%s1352_s5 + $0x48] sm:$0xff]  ;;  %v340_v29 = vld [vmem:[%s1352_s5 + $0x50] sm:$0xff]  ;;  %v341_v30 = vld [vmem:[%s1352_s5 + $0x58] sm:$0xff]  ;;  %s869_s5 = sshll.u32 %s1212_s18, 6 }
  0x32   : > { %s829_s15 = sshll.u32 %s1604_s29, 3  ;;  %989 = vmatpush3.bf16.msra.mxu0 %v986_v15  ;;  %1016 = vmatpush3.bf16.msra.mxu1 %v986_v15  ;;  %v1002_v28 = vpack.c.bf16 %v339_v27, %v338_v26  ;;  %v1006_v31 = vpack.c.bf16 %v341_v30, %v340_v29  ;;  %s827_s29 = sshll.u32 %s285_s26, 8 }
  0x33   : > { %s1363_s11 = scalar_lea.vmem %s1581_s0, %s829_s15  ;;  %991 = vmatprep.subr.bf16.mxu0 %v990_v17  ;;  %1011 = vmatprep.subr.bf16.mxu1 %v990_v17  ;;  %s1449_s4 = scalar_lea.vmem [#allocation3], %s827_s29 }
  0x34   : > { %v298_v20 = vld [vmem:[%s1363_s11] sm:$0xff]  ;;  %v299_v32 = vld [vmem:[%s1363_s11 + $0x8] sm:$0xff]  ;;  %v300_v34 = vld [vmem:[%s1363_s11 + $0x10] sm:$0xff]  ;;  %s295_s22 = scalar_select %p294_p4, %s1208_s17, 1 }
  0x35   : > { %v314_v21 = vld [vmem:[%s1363_s11 + $0x80] sm:$0xff]  ;;  %938 = vmatprep.mubr.msk.f32.mxu0 %vm349_vm0, %v298_v20  ;;  %v315_v33 = vld [vmem:[%s1363_s11 + $0x88] sm:$0xff]  ;;  %v316_v35 = vld [vmem:[%s1363_s11 + $0x90] sm:$0xff]  ;;  %s716_s15 = sadd.s32 %s1208_s17, %s869_s5  ;;  %s719_s17 = sshll.u32 %s1449_s4, 4  ;;  %s1513_s17 = int_to_ptr.vmem [resolvable:$true] %s719_s17 }
  0x36   : > { %962 = vmatprep.mubr.msk.f32.mxu1 %vm349_vm0, %v314_v21  ;;  %993 = vmatpush3.bf16.msra.mxu0 %v990_v17  ;;  %v301_v36 = vld [vmem:[%s1363_s11 + $0x18] sm:$0xff]  ;;  %v302_v38 = vld [vmem:[%s1363_s11 + $0x20] sm:$0xff]  ;;  %v303_v40 = vld [vmem:[%s1363_s11 + $0x28] sm:$0xff]  ;;  %s296_s28 = scalar_lea.vmem %s1583_s2, %s295_s22  ;;  %s866_s18 = sshll.u32 %s716_s15, 7 }
  0x37   : > { %1017 = vmatpush3.bf16.msra.mxu1 %v990_v17  ;;  %995 = vmatprep.subr.bf16.mxu0 %v994_v22  ;;  %v317_v37 = vld [vmem:[%s1363_s11 + $0x98] sm:$0xff]  ;;  %v318_v39 = vld [vmem:[%s1363_s11 + $0xa0] sm:$0xff]  ;;  %v319_v41 = vld [vmem:[%s1363_s11 + $0xa8] sm:$0xff]  ;;  %s1523_s22 = scalar_lea.sflag [#allocation4], %s285_s26  ;;  %s1114_s23 = scalar_lea.vmem %s1513_s17, 4096 }
  0x38   : > { %1012 = vmatprep.subr.bf16.mxu1 %v994_v22  ;;  %v304_v42 = vld [vmem:[%s1363_s11 + $0x30] sm:$0xff]  ;;  %v305_v44 = vld [vmem:[%s1363_s11 + $0x38] sm:$0xff]  ;;  %v306_v46 = vld [vmem:[%s1363_s11 + $0x40] sm:$0xff]  ;;  %p1115_p5 = scmp.ne.s32.totalorder %s1513_s17, %s1114_s23 }
  0x39   : > { %v320_v43 = vld [vmem:[%s1363_s11 + $0xb0] sm:$0xff]  ;;  %v321_v45 = vld [vmem:[%s1363_s11 + $0xb8] sm:$0xff]  ;;  %v322_v47 = vld [vmem:[%s1363_s11 + $0xc0] sm:$0xff] }
  0x3a   : > { %997 = vmatpush3.bf16.msra.mxu0 %v994_v22  ;;  %v307_v48 = vld [vmem:[%s1363_s11 + $0x48] sm:$0xff]  ;;  %v308_v50 = vld [vmem:[%s1363_s11 + $0x50] sm:$0xff]  ;;  %v309_v52 = vld [vmem:[%s1363_s11 + $0x58] sm:$0xff]  ;;  %p1116_p6 = pnand %p1115_p5, %p1329_p10 }
  0x3b   : > { %1018 = vmatpush3.bf16.msra.mxu1 %v994_v22  ;;  %999 = vmatprep.subr.bf16.mxu0 %v998_v25  ;;  %v323_v49 = vld [vmem:[%s1363_s11 + $0xc8] sm:$0xff]  ;;  %v324_v51 = vld [vmem:[%s1363_s11 + $0xd0] sm:$0xff]  ;;  %v325_v53 = vld [vmem:[%s1363_s11 + $0xd8] sm:$0xff] }
  0x3c   : > { %1013 = vmatprep.subr.bf16.mxu1 %v998_v25  ;;  %v310_v54 = vld [vmem:[%s1363_s11 + $0x60] sm:$0xff]  ;;  %v311_v56 = vld [vmem:[%s1363_s11 + $0x68] sm:$0xff]  ;;  %v312_v58 = vld [vmem:[%s1363_s11 + $0x70] sm:$0xff]  ;;  %p1117_p7 = pneg %p1116_p6 }
  0x3d   : > { %v326_v55 = vld [vmem:[%s1363_s11 + $0xe0] sm:$0xff]  ;;  %v327_v57 = vld [vmem:[%s1363_s11 + $0xe8] sm:$0xff]  ;;  %v328_v59 = vld [vmem:[%s1363_s11 + $0xf0] sm:$0xff] }
  0x3e   : > { %1001 = vmatpush3.bf16.msra.mxu0 %v998_v25  ;;  %v313_v60 = vld [vmem:[%s1363_s11 + $0x78] sm:$0xff]  ;;  %v1443_v62 = vld [vmem:[%s296_s28] ss:$0 sm:$0xff]  ;;  %s1118_s28 = sshll.u32 %s1226_s27, 4  ;;  %s1119_s28 = int_to_ptr.vmem [resolvable:$false] %s1118_s28 }
  0x3f   : > { %1019 = vmatpush3.bf16.msra.mxu1 %v998_v25  ;;  %1003 = vmatprep.subr.bf16.mxu0 %v1002_v28  ;;  %v329_v61 = vld [vmem:[%s1363_s11 + $0xf8] sm:$0xff]  ;;  %s1509_s11 = scalar_lea.hbm %s1584_s3, %s866_s18  ;;  %s1120_s29 = scalar_lea.vmem %s1119_s28, 8192 }
  0x40   : > { %1014 = vmatprep.subr.bf16.mxu1 %v1002_v28  ;;  %p1121_p8 = scmp.lt.s32.totalorder %s1513_s17, %s1119_s28  ;;  %p1122_p9 = scmp.lt.s32.totalorder %s1120_s29, %s1114_s23 }
  0x42   : > { %1005 = vmatpush3.bf16.msra.mxu0 %v1002_v28  ;;  %p1123_p11 = por %p1122_p9, %p1121_p8 }
  0x43   : > { %1020 = vmatpush3.bf16.msra.mxu1 %v1002_v28  ;;  %1007 = vmatprep.subr.bf16.mxu0 %v1006_v31 }
  0x44   : > { %1015 = vmatprep.subr.bf16.mxu1 %v1006_v31  ;;  %p1124_p13 = pnand %p1123_p11, %p1117_p7 }
  0x46   : > { %1009 = vmatpush3.bf16.msra.mxu0 %v1006_v31 }
  0x47   : > { %1021 = vmatpush3.bf16.msra.mxu1 %v1006_v31 }
  0x49   : > { %939 = vmatmul.mubr.msk.f32.vlgmr.msra.gmra.mrb[0].mxu0 %vm349_vm0, %v299_v32 }
  0x4a   : > { %963 = vmatmul.mubr.msk.f32.vlgmr.msra.gmra.mrb[0].mxu1 %vm349_vm0, %v315_v33  ;;  %941 = vmatprep.mubr.msk.f32.mxu0 %vm349_vm0, %v300_v34 }
  0x4b   : > { %965 = vmatprep.mubr.msk.f32.mxu1 %vm349_vm0, %v316_v35 }
  0x4d   : > { %942 = vmatmul.mubr.msk.f32.gmra.mrb[2].mxu0 %vm349_vm0, %v301_v36 }
  0x4e   : > { %966 = vmatmul.mubr.msk.f32.gmra.mrb[2].mxu1 %vm349_vm0, %v317_v37  ;;  %944 = vmatprep.mubr.msk.f32.mxu0 %vm349_vm0, %v302_v38 }
  0x4f   : > { %968 = vmatprep.mubr.msk.f32.mxu1 %vm349_vm0, %v318_v39 }
  0x51   : > { %945 = vmatmul.mubr.msk.f32.gmra.mrb[4].mxu0 %vm349_vm0, %v303_v40 }
  0x52   : > { %969 = vmatmul.mubr.msk.f32.gmra.mrb[4].mxu1 %vm349_vm0, %v319_v41  ;;  %947 = vmatprep.mubr.msk.f32.mxu0 %vm349_vm0, %v304_v42 }
  0x53   : > { %971 = vmatprep.mubr.msk.f32.mxu1 %vm349_vm0, %v320_v43 }
  0x55   : > { %948 = vmatmul.mubr.msk.f32.gmra.mrb[6].mxu0 %vm349_vm0, %v305_v44 }
  0x56   : > { %972 = vmatmul.mubr.msk.f32.gmra.mrb[6].mxu1 %vm349_vm0, %v321_v45  ;;  %950 = vmatprep.mubr.msk.f32.mxu0 %vm349_vm0, %v306_v46 }
  0x57   : > { %974 = vmatprep.mubr.msk.f32.mxu1 %vm349_vm0, %v322_v47 }
  0x59   : > { %951 = vmatmul.mubr.msk.f32.gmra.mrb[8].mxu0 %vm349_vm0, %v307_v48 }
  0x5a   : > { %975 = vmatmul.mubr.msk.f32.gmra.mrb[8].mxu1 %vm349_vm0, %v323_v49  ;;  %953 = vmatprep.mubr.msk.f32.mxu0 %vm349_vm0, %v308_v50 }
  0x5b   : > { %977 = vmatprep.mubr.msk.f32.mxu1 %vm349_vm0, %v324_v51 }
  0x5d   : > { %954 = vmatmul.mubr.msk.f32.gmra.mrb[10].mxu0 %vm349_vm0, %v309_v52 }
  0x5e   : > { %978 = vmatmul.mubr.msk.f32.gmra.mrb[10].mxu1 %vm349_vm0, %v325_v53  ;;  %956 = vmatprep.mubr.msk.f32.mxu0 %vm349_vm0, %v310_v54 }
  0x5f   : > { %980 = vmatprep.mubr.msk.f32.mxu1 %vm349_vm0, %v326_v55 }
  0x61   : > { %957 = vmatmul.mubr.msk.f32.gmra.mrb[12].mxu0 %vm349_vm0, %v311_v56 }
  0x62   : > { %981 = vmatmul.mubr.msk.f32.gmra.mrb[12].mxu1 %vm349_vm0, %v327_v57  ;;  %959 = vmatprep.mubr.msk.f32.mxu0 %vm349_vm0, %v312_v58 }
  0x63   : > { %983 = vmatprep.mubr.msk.f32.mxu1 %vm349_vm0, %v328_v59 }
  0x65   : > { %960 = vmatmul.mubr.msk.f32.gmra.mrb[14].mxu0 %vm349_vm0, %v313_v60 }
  0x66   : > { %984 = vmatmul.mubr.msk.f32.gmra.mrb[14].mxu1 %vm349_vm0, %v329_v61 }
 0x11c   : > { %v940_v63 = vpop.f32.mrb[0].mxu0 }
 0x11d   : > { %v964_v0 = vpop.f32.mrb[0].mxu1  ;;  %v518_v1 = vadd.f32 %v940_v63, %v1443_v62  ;;  %v512_v3 = vpop.f32.mrb[1].mxu0 }
 0x11e   : > { %v598_v2 = vadd.f32 %v964_v0, %v1443_v62  ;;  %v592_v4 = vpop.f32.mrb[1].mxu1  ;;  %v513_v5 = vadd.f32 %v1443_v62, %v512_v3 }
 0x11f   : > { %v593_v6 = vadd.f32 %v1443_v62, %v592_v4  ;;  %672 = vst [vmem:[%s1449_s4 + $0x8] sm:$0xff] %v518_v1 }
 0x120   : > { %688 = vst [vmem:[%s1449_s4 + $0x88] sm:$0xff] %v598_v2  ;;  %671 = vst [vmem:[%s1449_s4] sm:$0xff] %v513_v5  ;;  %v943_v7 = vpop.f32.mrb[2].mxu0 }
 0x121   : > { %687 = vst [vmem:[%s1449_s4 + $0x80] sm:$0xff] %v593_v6  ;;  %v967_v8 = vpop.f32.mrb[2].mxu1  ;;  %v528_v9 = vadd.f32 %v943_v7, %v1443_v62  ;;  %v522_v11 = vpop.f32.mrb[3].mxu0 }
 0x122   : > { %v608_v10 = vadd.f32 %v967_v8, %v1443_v62  ;;  %v602_v12 = vpop.f32.mrb[3].mxu1  ;;  %v523_v13 = vadd.f32 %v1443_v62, %v522_v11 }
 0x123   : > { %v603_v14 = vadd.f32 %v1443_v62, %v602_v12  ;;  %674 = vst [vmem:[%s1449_s4 + $0x18] sm:$0xff] %v528_v9 }
 0x124   : > { %690 = vst [vmem:[%s1449_s4 + $0x98] sm:$0xff] %v608_v10  ;;  %673 = vst [vmem:[%s1449_s4 + $0x10] sm:$0xff] %v523_v13  ;;  %v946_v15 = vpop.f32.mrb[4].mxu0 }
 0x125   : > { %689 = vst [vmem:[%s1449_s4 + $0x90] sm:$0xff] %v603_v14  ;;  %v970_v16 = vpop.f32.mrb[4].mxu1  ;;  %v538_v17 = vadd.f32 %v946_v15, %v1443_v62  ;;  %v532_v19 = vpop.f32.mrb[5].mxu0 }
 0x126   : > { %v618_v18 = vadd.f32 %v970_v16, %v1443_v62  ;;  %v612_v20 = vpop.f32.mrb[5].mxu1  ;;  %v533_v21 = vadd.f32 %v1443_v62, %v532_v19 }
 0x127   : > { %v613_v22 = vadd.f32 %v1443_v62, %v612_v20  ;;  %676 = vst [vmem:[%s1449_s4 + $0x28] sm:$0xff] %v538_v17 }
 0x128   : > { %692 = vst [vmem:[%s1449_s4 + $0xa8] sm:$0xff] %v618_v18  ;;  %675 = vst [vmem:[%s1449_s4 + $0x20] sm:$0xff] %v533_v21  ;;  %v949_v23 = vpop.f32.mrb[6].mxu0 }
 0x129   : > { %691 = vst [vmem:[%s1449_s4 + $0xa0] sm:$0xff] %v613_v22  ;;  %v973_v24 = vpop.f32.mrb[6].mxu1  ;;  %v548_v25 = vadd.f32 %v949_v23, %v1443_v62  ;;  %v542_v27 = vpop.f32.mrb[7].mxu0 }
 0x12a   : > { %v628_v26 = vadd.f32 %v973_v24, %v1443_v62  ;;  %v622_v28 = vpop.f32.mrb[7].mxu1  ;;  %v543_v29 = vadd.f32 %v1443_v62, %v542_v27 }
 0x12b   : > { %v623_v30 = vadd.f32 %v1443_v62, %v622_v28  ;;  %678 = vst [vmem:[%s1449_s4 + $0x38] sm:$0xff] %v548_v25 }
 0x12c   : > { %694 = vst [vmem:[%s1449_s4 + $0xb8] sm:$0xff] %v628_v26  ;;  %677 = vst [vmem:[%s1449_s4 + $0x30] sm:$0xff] %v543_v29  ;;  %v952_v31 = vpop.f32.mrb[8].mxu0 }
 0x12d   : > { %693 = vst [vmem:[%s1449_s4 + $0xb0] sm:$0xff] %v623_v30  ;;  %v976_v32 = vpop.f32.mrb[8].mxu1  ;;  %v558_v33 = vadd.f32 %v952_v31, %v1443_v62  ;;  %v552_v35 = vpop.f32.mrb[9].mxu0 }
 0x12e   : > { %v638_v34 = vadd.f32 %v976_v32, %v1443_v62  ;;  %v632_v36 = vpop.f32.mrb[9].mxu1  ;;  %v553_v37 = vadd.f32 %v1443_v62, %v552_v35 }
 0x12f   : > { %v633_v38 = vadd.f32 %v1443_v62, %v632_v36  ;;  %680 = vst [vmem:[%s1449_s4 + $0x48] sm:$0xff] %v558_v33 }
 0x130   : > { %696 = vst [vmem:[%s1449_s4 + $0xc8] sm:$0xff] %v638_v34  ;;  %679 = vst [vmem:[%s1449_s4 + $0x40] sm:$0xff] %v553_v37  ;;  %v955_v39 = vpop.f32.mrb[10].mxu0 }
 0x131   : > { %695 = vst [vmem:[%s1449_s4 + $0xc0] sm:$0xff] %v633_v38  ;;  %v979_v40 = vpop.f32.mrb[10].mxu1  ;;  %v568_v41 = vadd.f32 %v955_v39, %v1443_v62  ;;  %v562_v43 = vpop.f32.mrb[11].mxu0 }
 0x132   : > { %v648_v42 = vadd.f32 %v979_v40, %v1443_v62  ;;  %v642_v44 = vpop.f32.mrb[11].mxu1  ;;  %v563_v45 = vadd.f32 %v1443_v62, %v562_v43 }
 0x133   : > { %v643_v46 = vadd.f32 %v1443_v62, %v642_v44  ;;  %682 = vst [vmem:[%s1449_s4 + $0x58] sm:$0xff] %v568_v41 }
 0x134   : > { %698 = vst [vmem:[%s1449_s4 + $0xd8] sm:$0xff] %v648_v42  ;;  %681 = vst [vmem:[%s1449_s4 + $0x50] sm:$0xff] %v563_v45  ;;  %v958_v47 = vpop.f32.mrb[12].mxu0 }
 0x135   : > { %697 = vst [vmem:[%s1449_s4 + $0xd0] sm:$0xff] %v643_v46  ;;  %v982_v48 = vpop.f32.mrb[12].mxu1  ;;  %v578_v49 = vadd.f32 %v958_v47, %v1443_v62  ;;  %v572_v51 = vpop.f32.mrb[13].mxu0 }
 0x136   : > { %v658_v50 = vadd.f32 %v982_v48, %v1443_v62  ;;  %v652_v52 = vpop.f32.mrb[13].mxu1  ;;  %v573_v53 = vadd.f32 %v1443_v62, %v572_v51 }
 0x137   : > { %v653_v54 = vadd.f32 %v1443_v62, %v652_v52  ;;  %684 = vst [vmem:[%s1449_s4 + $0x68] sm:$0xff] %v578_v49 }
 0x138   : > { %700 = vst [vmem:[%s1449_s4 + $0xe8] sm:$0xff] %v658_v50  ;;  %683 = vst [vmem:[%s1449_s4 + $0x60] sm:$0xff] %v573_v53  ;;  %v961_v55 = vpop.f32.mrb[14].mxu0 }
 0x139   : > { %699 = vst [vmem:[%s1449_s4 + $0xe0] sm:$0xff] %v653_v54  ;;  %v985_v56 = vpop.f32.mrb[14].mxu1  ;;  %v588_v57 = vadd.f32 %v961_v55, %v1443_v62  ;;  %v582_v59 = vpop.f32.mrb[15].mxu0 }
 0x13a   : > { %v668_v58 = vadd.f32 %v985_v56, %v1443_v62  ;;  %v662_v60 = vpop.f32.mrb[15].mxu1  ;;  %v583_v61 = vadd.f32 %v1443_v62, %v582_v59 }
 0x13b   : > { %v663_v63 = vadd.f32 %v1443_v62, %v662_v60  ;;  %686 = vst [vmem:[%s1449_s4 + $0x78] sm:$0xff] %v588_v57 }
 0x13c   : > { %702 = vst [vmem:[%s1449_s4 + $0xf8] sm:$0xff] %v668_v58  ;;  %685 = vst [vmem:[%s1449_s4 + $0x70] sm:$0xff] %v583_v61 }
 0x13d   : > { %701 = vst [vmem:[%s1449_s4 + $0xf0] sm:$0xff] %v663_v63 }
 0x13e   : > { %1127 = shalt.err (!%p1124_p13)
}
 0x13f   : > { %s1128_s26 = scalar_lea.hbm %s1509_s11, 4096  ;;  %s1132_s15 = scalar_lea.hbm %s1584_s3, 16384 }
 0x140   : > { %p1129_p0 = scmp.ne.s32.totalorder %s1509_s11, %s1128_s26  ;;  %p1133_p3 = scmp.lt.u32.totalorder %s1509_s11, %s1584_s3 }
 0x141   : > { %p1134_p4 = scmp.lt.u32.totalorder %s1132_s15, %s1128_s26  ;;  %p1136_p6 = scmp.lt.u32.totalorder %s1128_s26, %s1509_s11 }
 0x142   : > { %p1130_p1 = pnand %p1129_p0, %p1329_p10 }
 0x143   : > { %p1135_p5 = por %p1134_p4, %p1133_p3 }
 0x144   : > { %p1131_p2 = pneg %p1130_p1 }
 0x145   : > { %p1137_p7 = por %p1136_p6, %p1135_p5 }
 0x147   : > { %p1138_p8 = pnand %p1137_p7, %p1131_p2 }
 0x149   : > { %1141 = shalt.err (!%p1138_p8)
}
 0x14a   : > { %s1227_s10 = smov 128   ;;  %s1228_s23 = smov 256  }
 0x14b   : > { %s1229_s27 = smov 8  }
 0x14c   : > { %1024 = dma.vmem_to_hbm [thread:$0]  (%p1329_p10), %s1513_s17, 4096, %s1509_s11, %s1523_s22, %s1227_s10, %s1228_s23, %s1229_s27  }
 0x14d PF: > { %p1030_p9 = scmp.ge.s32.totalorder %s1224_s21, 2  ;;  %s734_s28 = sand.u32 1, %s1188_s12  }
 0x14e   : > { %s735_s29 = scalar_lea.sflag [#allocation4], %s734_s28 }
 0x14f   : > { %p1027_p11 = pnand %p1030_p9, %p1336_p12 }
 0x151   : > { %1183 = dma.done.wait (!%p1027_p11), %s735_s29, 4096  }
 0x152   : > { %1185 = vsyncadd (!%p1027_p11), %s735_s29, 4294963200  ;;  %s16_s21 = sadd.s32 1, %s1224_s21   ;;  %s1588_s12 = smov %s1192_s13 }
 0x153   : > { %p13_p13 = scmp.ge.s32.totalorder %s16_s21, 6   ;;  %s1589_s13 = smov %s1196_s14 }
 0x154   : > { %s1590_s14 = smov %s1334_s7  ;;  %s1591_s15 = smov %s1204_s16 }
 0x155   : > { %s1592_s16 = smov %s1323_s30  ;;  %s1593_s17 = smov %s1216_s19 }
 0x156   : > { %s1594_s18 = smov %s1220_s20  ;;  %s1595_s19 = smov %s1598_s24 }
 0x157   : > { %s1596_s20 = smov %s1602_s25  ;;  %15 = sbr.rel (!%p13_p13) target bundleno = 6 (0x6), region = 116 }
 0x15e   :  { %740 = vsyncpa [#allocation4], 1 }
 0x15f   :  { %742 = vsyncpa [#allocation4 + $0x1], 1 }

</bundles_post_ra>
